<compile_context>
chip_gen: v5e
topology: v5e:2x2
jax: 0.10.0
libtpu: 0.0.40
codegen_flags: <defaults>
</compile_context>

<pallas_src>
import functools

import jax
import jax.numpy as jnp
from jax.experimental import pallas as pl
from jax.experimental.pallas import tpu as pltpu

LANE = 128
BIAS_ROWS = 16  # bias block at the end of the slab (16-row aligned for bf16 packing)


def _round_up(n, m):
    return (n + m - 1) // m * m


def vamlp_kernel(x_ref, w_ref, out_ref, *, in_features, k1):
    """Whole dueling MLP on one batch tile.

    x_ref  : (TB, in_features)        f32 input states (unpadded)
    w_ref  : (k1 + 4*128 + 16, 128)   packed weight+bias slab (bf16 or f32)
    out_ref: (TB, 128)                f32, lanes >= action_dim are zero
    """
    r1 = k1
    r2 = r1 + LANE
    r3 = r2 + LANE
    r4 = r3 + LANE
    r5 = r4 + LANE
    cdt = w_ref.dtype                                  # MXU operand dtype

    # Packed bias rows (rows 0..4 used); bias math + ReLU kept in f32.
    b = w_ref[r5:r5 + BIAS_ROWS, :].astype(jnp.float32)

    x = x_ref[...].astype(cdt)

    # trunk: Linear(in,128)+ReLU -> Linear(128,64)+ReLU -> Linear(64,32)+ReLU
    # (all out-dims zero-padded to 128 lanes; padded lanes stay exactly 0)
    h = jnp.dot(x, w_ref[0:in_features, :], preferred_element_type=jnp.float32) + b[0:1, :]
    h = jnp.maximum(h, 0.0)
    h = jnp.dot(h.astype(cdt), w_ref[r1:r2, :], preferred_element_type=jnp.float32) + b[1:2, :]
    h = jnp.maximum(h, 0.0)
    h = jnp.dot(h.astype(cdt), w_ref[r2:r3, :], preferred_element_type=jnp.float32) + b[2:3, :]
    h = jnp.maximum(h, 0.0)

    # fused heads, layer 1: lanes 0..31 = adv hidden, lanes 32..63 = val hidden
    h = jnp.dot(h.astype(cdt), w_ref[r3:r4, :], preferred_element_type=jnp.float32) + b[3:4, :]
    h = jnp.maximum(h, 0.0)

    # fused heads, layer 2: dueling combine + biases folded into the weights,
    # so this dot directly yields  val + adv - mean(adv)  in lanes 0..A-1.
    out_ref[...] = (
        jnp.dot(h.astype(cdt), w_ref[r4:r5, :], preferred_element_type=jnp.float32) + b[4:5, :]
    )


def vamlp_forward(x, w_slab, action_dim, *, batch_block=None):
    """x: (B, in_features) f32; w_slab from pack_params. Returns (B, action_dim) f32."""
    batch, in_features = x.shape
    k1 = _round_up(in_features, 16)

    # Single-step (whole batch) by default: best on v6e/v5e (1 TC). For very
    # large batches on v7x pass batch_block so the parallel grid uses both TCs.
    if batch_block is None or batch_block >= batch:
        batch_block = batch
        steps = 1
    else:
        batch_block = _round_up(batch_block, 8)        # (8,128) sublane rule
        steps = pl.cdiv(batch, batch_block)

    # Per-step compute is tiny; deepen x/out buffering when the pipeline is long.
    pmode = pl.Buffered(3) if steps >= 3 else None
    x_spec = pl.BlockSpec((batch_block, in_features), lambda i: (i, 0), pipeline_mode=pmode)
    w_spec = pl.BlockSpec(w_slab.shape, lambda i: (0, 0))   # resident across steps
    o_spec = pl.BlockSpec((batch_block, LANE), lambda i: (i, 0), pipeline_mode=pmode)

    itemsize = lambda a: a.size * a.dtype.itemsize
    cost = pl.CostEstimate(
        flops=2 * batch * LANE * (k1 + 4 * LANE),
        transcendentals=0,
        bytes_accessed=itemsize(x) + itemsize(w_slab) + batch * LANE * 4,
    )

    kernel = functools.partial(vamlp_kernel, in_features=in_features, k1=k1)
    out = pl.pallas_call(
        kernel,
        out_shape=jax.ShapeDtypeStruct((batch, LANE), jnp.float32),
        grid=(steps,),
        in_specs=[x_spec, w_spec],
        out_specs=o_spec,
        compiler_params=pltpu.CompilerParams(dimension_semantics=("parallel",)),
        cost_estimate=cost,
    )(x, w_slab)
    return out[:, :action_dim]


def pack_params(params, in_features, action_dim, dtype=jnp.bfloat16):
    """Pack all 7 (W, b) pairs into ONE zero-padded slab (weights + bias rows).

    Weights are (in, out) (transposed vs. nn.Linear). Heads are fused:
      head layer 1:  [wa1 | wv1]  -> (32, 64)
      head layer 2:  the dueling combine and both final biases are folded in:
        w[:, j] = [wa2[:, j] - mean_k wa2[:, k] ; wv2],  b[j] = ba2[j]-mean(ba2)+bv2
    Every out-dim is zero-padded to 128 lanes; rows for padded input lanes are
    zero, so padded lanes carry exactly 0 through every layer.
    """
    (w1, b1, w2, b2, w3, b3, wa1, ba1, wa2, ba2, wv1, bv1, wv2, bv2) = params
    k1 = _round_up(in_features, 16)

    wh1 = jnp.concatenate([wa1, wv1], axis=1)                       # (32, 64)
    bh1 = jnp.concatenate([ba1, bv1], axis=1)                       # (1, 64)

    wa2c = wa2 - jnp.mean(wa2, axis=1, keepdims=True)               # (32, A)
    wv2b = jnp.broadcast_to(wv2, (wv2.shape[0], action_dim))        # (32, A)
    wh2 = jnp.concatenate([wa2c, wv2b], axis=0)                     # (64, A)
    bh2 = (ba2 - jnp.mean(ba2, axis=1, keepdims=True)) + bv2        # (1, A)

    def pad_w(w, rows):
        out = jnp.zeros((rows, LANE), jnp.float32)
        return out.at[: w.shape[0], : w.shape[1]].set(w)

    bias_rows = jnp.zeros((BIAS_ROWS, LANE), jnp.float32)
    for r, bias in enumerate((b1, b2, b3, bh1, bh2)):
        bias_rows = bias_rows.at[r, : bias.shape[1]].set(bias[0])

    w_slab = jnp.concatenate(
        [pad_w(w1, k1), pad_w(w2, LANE), pad_w(w3, LANE),
         pad_w(wh1, LANE), pad_w(wh2, LANE), bias_rows], axis=0)    # (k1+528, 128)
    return w_slab.astype(dtype)


def init_params(key, in_features, action_dim):
    """Deterministic nn.Linear-style init; weights stored (in, out), biases (1, out)."""
    dims = [
        (in_features, 128),  # layers.0
        (128, 64),           # layers.2
        (64, 32),            # layers.4
        (32, 32),            # adv_layer.0
        (32, action_dim),    # adv_layer.2
        (32, 32),            # val_layer.0
        (32, 1),             # val_layer.2
    ]
    params = []
    for (fan_in, fan_out) in dims:
        key, kw, kb = jax.random.split(key, 3)
        bound = 1.0 / jnp.sqrt(fan_in)
        w = jax.random.uniform(kw, (fan_in, fan_out), jnp.float32, -bound, bound)
        b = jax.random.uniform(kb, (1, fan_out), jnp.float32, -bound, bound)
        params.extend([w, b])
    return tuple(params)


def vamlp_reference(x, params):
    (w1, b1, w2, b2, w3, b3, wa1, ba1, wa2, ba2, wv1, bv1, wv2, bv2) = params
    h = jnp.maximum(x @ w1 + b1, 0.0)
    h = jnp.maximum(h @ w2 + b2, 0.0)
    h = jnp.maximum(h @ w3 + b3, 0.0)
    adv = jnp.maximum(h @ wa1 + ba1, 0.0) @ wa2 + ba2
    val = jnp.maximum(h @ wv1 + bv1, 0.0) @ wv2 + bv2
    return val + adv - jnp.mean(adv, axis=-1, keepdims=True)


if __name__ == "__main__":
    in_features = 16
    action_dim = 4
    batch = 8

    key = jax.random.PRNGKey(0)
    key, kx = jax.random.split(key)
    x = jax.random.normal(kx, (batch, in_features), jnp.float32)
    params = init_params(key, in_features, action_dim)
    ref = jax.block_until_ready(vamlp_reference(x, params))

    # f32 slab path: tight agreement (fold only reorders the final summation).
    w_f32 = pack_params(params, in_features, action_dim, dtype=jnp.float32)
    out_f32 = jax.block_until_ready(vamlp_forward(x, w_f32, action_dim))
    assert out_f32.shape == (batch, action_dim)
    assert jnp.allclose(out_f32, ref, atol=1e-4, rtol=1e-4), float(jnp.max(jnp.abs(out_f32 - ref)))

    # bf16 slab path (default): half the weight DMA bytes, single-pass bf16 MXU.
    w_bf16 = pack_params(params, in_features, action_dim)  # bf16
    out_bf16 = jax.block_until_ready(vamlp_forward(x, w_bf16, action_dim))
    assert out_bf16.shape == (batch, action_dim)
    assert jnp.allclose(out_bf16, ref, atol=5e-2, rtol=5e-2), float(jnp.max(jnp.abs(out_bf16 - ref)))

    print("KERNEL_OK")
</pallas_src>

<mosaic_0001>
module attributes {stable_mosaic.version = 11 : i64} {
  func.func @vamlp_kernel(%arg0: i32, %arg1: memref<8x16xf32, #tpu.memory_space<vmem>>, %arg2: memref<544x128xf32, #tpu.memory_space<vmem>>, %arg3: memref<8x128xf32, #tpu.memory_space<vmem>>) attributes {dimension_semantics = [#tpu.dimension_semantics<parallel>], iteration_bounds = array<i64: 1>, scalar_prefetch = 0 : i64, scratch_operands = 0 : i64, tpu.core_type = #tpu.core_type<tc>, window_params = [{transform_indices = @transform_0, window_bounds = array<i64: 8, 16>}, {pipeline_mode = #tpu.pipeline_mode<synchronous>, transform_indices = @transform_1, window_bounds = array<i64: 544, 128>}, {transform_indices = @transform_2, window_bounds = array<i64: 8, 128>}]} {
    %c528 = arith.constant 528 : index
    %c0 = arith.constant 0 : index
    %0 = vector.load %arg2[%c528, %c0] : memref<544x128xf32, #tpu.memory_space<vmem>>, vector<16x128xf32>
    %c0_0 = arith.constant 0 : index
    %c0_1 = arith.constant 0 : index
    %1 = vector.load %arg1[%c0_0, %c0_1] : memref<8x16xf32, #tpu.memory_space<vmem>>, vector<8x16xf32>
    %c0_2 = arith.constant 0 : index
    %c0_3 = arith.constant 0 : index
    %2 = vector.load %arg2[%c0_2, %c0_3] : memref<544x128xf32, #tpu.memory_space<vmem>>, vector<16x128xf32>
    %cst = arith.constant dense<0.000000e+00> : vector<8x128xf32>
    %3 = tpu.matmul %1, %2, %cst {dimension_numbers = #tpu.dot_dimension_numbers<[1], [0], [0], [1], [0, 0, 1, 1], [], []>} : vector<8x16xf32>, vector<16x128xf32>, vector<8x128xf32> -> vector<8x128xf32>
    %4 = vector.extract_strided_slice %0 {offsets = [0, 0], sizes = [1, 128], strides = [1, 1]} : vector<16x128xf32> to vector<1x128xf32>
    %5 = vector.broadcast %4 : vector<1x128xf32> to vector<8x128xf32>
    %6 = arith.addf %3, %5 : vector<8x128xf32>
    %cst_4 = arith.constant 0.000000e+00 : f32
    %7 = vector.broadcast %cst_4 : f32 to vector<8x128xf32>
    %8 = arith.maximumf %6, %7 : vector<8x128xf32>
    %c16 = arith.constant 16 : index
    %c0_5 = arith.constant 0 : index
    %9 = vector.load %arg2[%c16, %c0_5] : memref<544x128xf32, #tpu.memory_space<vmem>>, vector<128x128xf32>
    %cst_6 = arith.constant dense<0.000000e+00> : vector<8x128xf32>
    %10 = tpu.matmul %8, %9, %cst_6 {dimension_numbers = #tpu.dot_dimension_numbers<[1], [0], [0], [1], [0, 0, 1, 1], [], []>} : vector<8x128xf32>, vector<128x128xf32>, vector<8x128xf32> -> vector<8x128xf32>
    %11 = vector.extract_strided_slice %0 {offsets = [1, 0], sizes = [1, 128], strides = [1, 1]} : vector<16x128xf32> to vector<1x128xf32>
    %12 = vector.broadcast %11 : vector<1x128xf32> to vector<8x128xf32>
    %13 = arith.addf %10, %12 : vector<8x128xf32>
    %cst_7 = arith.constant 0.000000e+00 : f32
    %14 = vector.broadcast %cst_7 : f32 to vector<8x128xf32>
    %15 = arith.maximumf %13, %14 : vector<8x128xf32>
    %c144 = arith.constant 144 : index
    %c0_8 = arith.constant 0 : index
    %16 = vector.load %arg2[%c144, %c0_8] : memref<544x128xf32, #tpu.memory_space<vmem>>, vector<128x128xf32>
    %cst_9 = arith.constant dense<0.000000e+00> : vector<8x128xf32>
    %17 = tpu.matmul %15, %16, %cst_9 {dimension_numbers = #tpu.dot_dimension_numbers<[1], [0], [0], [1], [0, 0, 1, 1], [], []>} : vector<8x128xf32>, vector<128x128xf32>, vector<8x128xf32> -> vector<8x128xf32>
    %18 = vector.extract_strided_slice %0 {offsets = [2, 0], sizes = [1, 128], strides = [1, 1]} : vector<16x128xf32> to vector<1x128xf32>
    %19 = vector.broadcast %18 : vector<1x128xf32> to vector<8x128xf32>
    %20 = arith.addf %17, %19 : vector<8x128xf32>
    %cst_10 = arith.constant 0.000000e+00 : f32
    %21 = vector.broadcast %cst_10 : f32 to vector<8x128xf32>
    %22 = arith.maximumf %20, %21 : vector<8x128xf32>
    %c272 = arith.constant 272 : index
    %c0_11 = arith.constant 0 : index
    %23 = vector.load %arg2[%c272, %c0_11] : memref<544x128xf32, #tpu.memory_space<vmem>>, vector<128x128xf32>
    %cst_12 = arith.constant dense<0.000000e+00> : vector<8x128xf32>
    %24 = tpu.matmul %22, %23, %cst_12 {dimension_numbers = #tpu.dot_dimension_numbers<[1], [0], [0], [1], [0, 0, 1, 1], [], []>} : vector<8x128xf32>, vector<128x128xf32>, vector<8x128xf32> -> vector<8x128xf32>
    %25 = vector.extract_strided_slice %0 {offsets = [3, 0], sizes = [1, 128], strides = [1, 1]} : vector<16x128xf32> to vector<1x128xf32>
    %26 = vector.broadcast %25 : vector<1x128xf32> to vector<8x128xf32>
    %27 = arith.addf %24, %26 : vector<8x128xf32>
    %cst_13 = arith.constant 0.000000e+00 : f32
    %28 = vector.broadcast %cst_13 : f32 to vector<8x128xf32>
    %29 = arith.maximumf %27, %28 : vector<8x128xf32>
    %c400 = arith.constant 400 : index
    %c0_14 = arith.constant 0 : index
    %30 = vector.load %arg2[%c400, %c0_14] : memref<544x128xf32, #tpu.memory_space<vmem>>, vector<128x128xf32>
    %cst_15 = arith.constant dense<0.000000e+00> : vector<8x128xf32>
    %31 = tpu.matmul %29, %30, %cst_15 {dimension_numbers = #tpu.dot_dimension_numbers<[1], [0], [0], [1], [0, 0, 1, 1], [], []>} : vector<8x128xf32>, vector<128x128xf32>, vector<8x128xf32> -> vector<8x128xf32>
    %32 = vector.extract_strided_slice %0 {offsets = [4, 0], sizes = [1, 128], strides = [1, 1]} : vector<16x128xf32> to vector<1x128xf32>
    %33 = vector.broadcast %32 : vector<1x128xf32> to vector<8x128xf32>
    %34 = arith.addf %31, %33 : vector<8x128xf32>
    %c0_16 = arith.constant 0 : index
    %c0_17 = arith.constant 0 : index
    %35 = vector.load %arg3[%c0_16, %c0_17] : memref<8x128xf32, #tpu.memory_space<vmem>>, vector<8x128xf32>
    tpu.vector_store %arg3[%c0_16, %c0_17], %34 {strides = array<i32>} : memref<8x128xf32, #tpu.memory_space<vmem>>, vector<8x128xf32>,
    return
  }
  func.func @transform_0(%arg0: i32) -> (i32, i32) {
    %c0_i32 = arith.constant 0 : i32
    %c0_i32_0 = arith.constant 0 : i32
    return %arg0, %c0_i32 : i32, i32
  }
  func.func @transform_1(%arg0: i32) -> (i32, i32) {
    %c0_i32 = arith.constant 0 : i32
    %c0_i32_0 = arith.constant 0 : i32
    %c0_i32_1 = arith.constant 0 : i32
    return %c0_i32, %c0_i32_0 : i32, i32
  }
  func.func @transform_2(%arg0: i32) -> (i32, i32) {
    %c0_i32 = arith.constant 0 : i32
    %c0_i32_0 = arith.constant 0 : i32
    return %arg0, %c0_i32 : i32, i32
  }
}

</mosaic_0001>

<bundles_post_ra>
// kernel: tpu_custom_call.1
= control target key start
LH: loop header
LB: loop body
LE: loop exit
PB: predicated region body
PF: predicated region fallthrough
CT: control target
= control target key end

     0   :  { %7 = vsyncpa [#allocation3], 0  ;;  %s362_s0 = inlined_call_operand.hbm [shape: f32[8,16], index: 0, kind: input, shape index: {}]   ;;  %s363_s1 = inlined_call_operand.hbm [shape: f32[544,128], index: 1, kind: input, shape index: {}]   ;;  %s364_s2 = inlined_call_operand.hbm [shape: f32[8,128], index: 2, kind: output, shape index: {}]  }
   0x1   :  { %8 = vsyncpa [#allocation6], 0 }
   0x2   :  { %9 = vsyncpa [#allocation4], 0  ;;  %s15_s11 = sshll.u32 %s362_s0, 4  ;;  %s326_s12 = smov [#allocation2]   ;;  %s16_s11 = int_to_ptr.hbm [resolvable:$true] %s15_s11 }
   0x3   :  { %s17_s13 = sshll.u32 %s326_s12, 4  ;;  %s25_s16 = sshll.u32 %s363_s1, 4  ;;  %s18_s13 = int_to_ptr.vmem [resolvable:$true] %s17_s13  ;;  %s26_s16 = int_to_ptr.hbm [resolvable:$true] %s25_s16 }
   0x4   :  { %20 = dma.hbm_to_vmem [thread:$0]  %s16_s11, 128, %s18_s13, [#allocation3]  }
   0x5   :  { %s327_s17 = smov [#allocation5]   ;;  %s328_s19 = smov 128  }
   0x6   :  { %s27_s18 = sshll.u32 %s327_s17, 4  ;;  %s329_s20 = smov 8   ;;  %s28_s18 = int_to_ptr.vmem [resolvable:$true] %s27_s18 }
   0x7   :  { %33 = dma.hbm_to_vmem [thread:$0]  %s26_s16, 8704, %s28_s18, [#allocation6], %s328_s19, %s328_s19, %s329_s20  }
   0x8   :  { %320 = dma.done.wait [#allocation3], 128  }
   0x9   :  { %321 = vsyncadd [#allocation3], 4294967168 }
   0xa   :  { %322 = dma.done.wait [#allocation6], 8704  }
   0xb   :  { %323 = vsyncadd [#allocation6], 4294958592  ;;  %v45_v0 = vld [vmem:[#allocation5 + $0x8] sm:$0xff]  ;;  %v44_v1 = vld [vmem:[#allocation5] sm:$0xff]  ;;  %vm47_vm0 = vcmask 130048   ;;  %s330_s0 = smov [#allocation7]  }
   0xc   :  { %65 = vmatpush.msra.mxu0 %v45_v0  ;;  %v43_v2 = vld [vmem:[#allocation2] sm:$0xff]  ;;  %v87_v3 = vld [vmem:[#allocation5 + $0x88] sm:$0xff]  ;;  %v86_v4 = vld [vmem:[#allocation5 + $0x80] sm:$0xff]  ;;  %s229_s1 = sshll.u32 %s330_s0, 4  ;;  %s231_s23 = sshll.u32 %s364_s2, 4  ;;  %s230_s1 = int_to_ptr.vmem [resolvable:$true] %s229_s1  ;;  %s232_s23 = int_to_ptr.hbm [resolvable:$true] %s231_s23 }
   0xd   :  { %89 = vmatpush.msra.mxu1 %v87_v3  ;;  %v85_v5 = vld [vmem:[#allocation5 + $0x78] sm:$0xff]  ;;  %v84_v6 = vld [vmem:[#allocation5 + $0x70] sm:$0xff]  ;;  %v83_v7 = vld [vmem:[#allocation5 + $0x68] sm:$0xff] }
   0xe   :  { %66 = vmatpush.msra.mxu0 %v44_v1  ;;  %v82_v8 = vld [vmem:[#allocation5 + $0x60] sm:$0xff]  ;;  %v81_v9 = vld [vmem:[#allocation5 + $0x58] sm:$0xff]  ;;  %v80_v10 = vld [vmem:[#allocation5 + $0x50] sm:$0xff] }
   0xf   :  { %242 = vmatmul.msk.f32.vlgmr.msra.gmra.mxu0 %vm47_vm0, %v43_v2  ;;  %90 = vmatpush.msra.mxu1 %v86_v4  ;;  %v79_v11 = vld [vmem:[#allocation5 + $0x48] sm:$0xff]  ;;  %v78_v12 = vld [vmem:[#allocation5 + $0x40] sm:$0xff]  ;;  %v77_v13 = vld [vmem:[#allocation5 + $0x38] sm:$0xff] }
  0x10   :  { %v76_v14 = vld [vmem:[#allocation5 + $0x30] sm:$0xff]  ;;  %v75_v15 = vld [vmem:[#allocation5 + $0x28] sm:$0xff]  ;;  %v74_v16 = vld [vmem:[#allocation5 + $0x20] sm:$0xff] }
  0x11   :  { %91 = vmatpush.msra.mxu1 %v85_v5  ;;  %v73_v17 = vld [vmem:[#allocation5 + $0x18] sm:$0xff]  ;;  %v72_v18 = vld [vmem:[#allocation5 + $0x10] sm:$0xff]  ;;  %v125_v19 = vld [vmem:[#allocation5 + $0x108] sm:$0xff] }
  0x12   :  { %v124_v20 = vld [vmem:[#allocation5 + $0x100] sm:$0xff]  ;;  %127 = vmatpush.msra.mxu2 %v125_v19  ;;  %v123_v21 = vld [vmem:[#allocation5 + $0xf8] sm:$0xff]  ;;  %v122_v22 = vld [vmem:[#allocation5 + $0xf0] sm:$0xff] }
  0x13   :  { %92 = vmatpush.msra.mxu1 %v84_v6  ;;  %v121_v23 = vld [vmem:[#allocation5 + $0xe8] sm:$0xff]  ;;  %v120_v24 = vld [vmem:[#allocation5 + $0xe0] sm:$0xff]  ;;  %v119_v25 = vld [vmem:[#allocation5 + $0xd8] sm:$0xff] }
  0x14   :  { %128 = vmatpush.msra.mxu2 %v124_v20  ;;  %v118_v26 = vld [vmem:[#allocation5 + $0xd0] sm:$0xff]  ;;  %v117_v27 = vld [vmem:[#allocation5 + $0xc8] sm:$0xff]  ;;  %v116_v28 = vld [vmem:[#allocation5 + $0xc0] sm:$0xff] }
  0x15   :  { %93 = vmatpush.msra.mxu1 %v83_v7  ;;  %v115_v29 = vld [vmem:[#allocation5 + $0xb8] sm:$0xff]  ;;  %v114_v30 = vld [vmem:[#allocation5 + $0xb0] sm:$0xff]  ;;  %v113_v32 = vld [vmem:[#allocation5 + $0xa8] sm:$0xff] }
  0x16   :  { %129 = vmatpush.msra.mxu2 %v123_v21  ;;  %v352_v31 = vld [vmem:[#allocation5 + $0x210] sm:$0xff]  ;;  %v112_v37 = vld [vmem:[#allocation5 + $0xa0] sm:$0xff]  ;;  %v111_v38 = vld [vmem:[#allocation5 + $0x98] sm:$0xff] }
  0x17   :  { %94 = vmatpush.msra.mxu1 %v82_v8  ;;  %v46_v33 = vperm.slane %v352_v31, 0  ;;  %v110_v39 = vld [vmem:[#allocation5 + $0x90] sm:$0xff]  ;;  %v163_v40 = vld [vmem:[#allocation5 + $0x188] sm:$0xff]  ;;  %v162_v41 = vld [vmem:[#allocation5 + $0x180] sm:$0xff]  ;;  %v88_v53 = vperm.slane %v352_v31, 1  ;;  %v202_v20 = vperm.slane %v352_v31, 4 }
  0x18   :  { %130 = vmatpush.msra.mxu2 %v122_v22  ;;  %165 = vmatpush.msra.mxu3 %v163_v40  ;;  %v161_v42 = vld [vmem:[#allocation5 + $0x178] sm:$0xff]  ;;  %v160_v43 = vld [vmem:[#allocation5 + $0x170] sm:$0xff]  ;;  %v159_v44 = vld [vmem:[#allocation5 + $0x168] sm:$0xff] }
  0x19   :  { %95 = vmatpush.msra.mxu1 %v81_v9  ;;  %v158_v45 = vld [vmem:[#allocation5 + $0x160] sm:$0xff]  ;;  %v157_v46 = vld [vmem:[#allocation5 + $0x158] sm:$0xff]  ;;  %v156_v47 = vld [vmem:[#allocation5 + $0x150] sm:$0xff]  ;;  %v126_v9 = vperm.slane %v352_v31, 2 }
  0x1a   :  { %131 = vmatpush.msra.mxu2 %v121_v23  ;;  %166 = vmatpush.msra.mxu3 %v162_v41  ;;  %v155_v48 = vld [vmem:[#allocation5 + $0x148] sm:$0xff]  ;;  %v154_v49 = vld [vmem:[#allocation5 + $0x140] sm:$0xff]  ;;  %v153_v50 = vld [vmem:[#allocation5 + $0x138] sm:$0xff] }
  0x1b   :  { %96 = vmatpush.msra.mxu1 %v80_v10  ;;  %v152_v51 = vld [vmem:[#allocation5 + $0x130] sm:$0xff]  ;;  %v151_v52 = vld [vmem:[#allocation5 + $0x128] sm:$0xff]  ;;  %v150_v57 = vld [vmem:[#allocation5 + $0x120] sm:$0xff] }
  0x1c   :  { %132 = vmatpush.msra.mxu2 %v120_v24  ;;  %167 = vmatpush.msra.mxu3 %v161_v42  ;;  %v149_v58 = vld [vmem:[#allocation5 + $0x118] sm:$0xff]  ;;  %v148_v59 = vld [vmem:[#allocation5 + $0x110] sm:$0xff]  ;;  %v201_v60 = vld [vmem:[#allocation5 + $0x208] sm:$0xff] }
  0x1d   :  { %97 = vmatpush.msra.mxu1 %v79_v11  ;;  %v200_v61 = vld [vmem:[#allocation5 + $0x200] sm:$0xff]  ;;  %203 = vmatpush.msrb.mxu0 %v201_v60  ;;  %v199_v62 = vld [vmem:[#allocation5 + $0x1f8] sm:$0xff]  ;;  %v198_v63 = vld [vmem:[#allocation5 + $0x1f0] sm:$0xff] }
  0x1e   :  { %133 = vmatpush.msra.mxu2 %v119_v25  ;;  %168 = vmatpush.msra.mxu3 %v160_v43  ;;  %v197_v0 = vld [vmem:[#allocation5 + $0x1e8] sm:$0xff]  ;;  %v196_v1 = vld [vmem:[#allocation5 + $0x1e0] sm:$0xff]  ;;  %v195_v2 = vld [vmem:[#allocation5 + $0x1d8] sm:$0xff] }
  0x1f   :  { %98 = vmatpush.msra.mxu1 %v78_v12  ;;  %204 = vmatpush.msrb.mxu0 %v200_v61  ;;  %v194_v3 = vld [vmem:[#allocation5 + $0x1d0] sm:$0xff]  ;;  %v193_v4 = vld [vmem:[#allocation5 + $0x1c8] sm:$0xff]  ;;  %v192_v5 = vld [vmem:[#allocation5 + $0x1c0] sm:$0xff] }
  0x20   :  { %134 = vmatpush.msra.mxu2 %v118_v26  ;;  %169 = vmatpush.msra.mxu3 %v159_v44  ;;  %v191_v6 = vld [vmem:[#allocation5 + $0x1b8] sm:$0xff]  ;;  %v190_v7 = vld [vmem:[#allocation5 + $0x1b0] sm:$0xff]  ;;  %v189_v8 = vld [vmem:[#allocation5 + $0x1a8] sm:$0xff] }
  0x21   :  { %99 = vmatpush.msra.mxu1 %v77_v13  ;;  %205 = vmatpush.msrb.mxu0 %v199_v62  ;;  %v188_v13 = vld [vmem:[#allocation5 + $0x1a0] sm:$0xff] }
  0x22   :  { %135 = vmatpush.msra.mxu2 %v117_v27  ;;  %170 = vmatpush.msra.mxu3 %v158_v45 }
  0x23   :  { %100 = vmatpush.msra.mxu1 %v76_v14  ;;  %206 = vmatpush.msrb.mxu0 %v198_v63  ;;  %v187_v14 = vld [vmem:[#allocation5 + $0x198] sm:$0xff] }
  0x24   :  { %136 = vmatpush.msra.mxu2 %v116_v28  ;;  %171 = vmatpush.msra.mxu3 %v157_v46 }
  0x25   :  { %101 = vmatpush.msra.mxu1 %v75_v15  ;;  %207 = vmatpush.msrb.mxu0 %v197_v0  ;;  %v186_v15 = vld [vmem:[#allocation5 + $0x190] sm:$0xff] }
  0x26   :  { %137 = vmatpush.msra.mxu2 %v115_v29  ;;  %172 = vmatpush.msra.mxu3 %v156_v47 }
  0x27   :  { %102 = vmatpush.msra.mxu1 %v74_v16  ;;  %208 = vmatpush.msrb.mxu0 %v196_v1  ;;  %v164_v16 = vperm.slane %v352_v31, 3 }
  0x28   :  { %138 = vmatpush.msra.mxu2 %v114_v30  ;;  %173 = vmatpush.msra.mxu3 %v155_v48 }
  0x29   :  { %103 = vmatpush.msra.mxu1 %v73_v17  ;;  %209 = vmatpush.msrb.mxu0 %v195_v2 }
  0x2a   :  { %139 = vmatpush.msra.mxu2 %v113_v32  ;;  %174 = vmatpush.msra.mxu3 %v154_v49 }
  0x2b   :  { %104 = vmatpush.msra.mxu1 %v72_v18  ;;  %210 = vmatpush.msrb.mxu0 %v194_v3 }
  0x2c   :  { %140 = vmatpush.msra.mxu2 %v112_v37  ;;  %175 = vmatpush.msra.mxu3 %v153_v50 }
  0x2d   :  { %211 = vmatpush.msrb.mxu0 %v193_v4 }
  0x2e   :  { %141 = vmatpush.msra.mxu2 %v111_v38  ;;  %176 = vmatpush.msra.mxu3 %v152_v51 }
  0x2f   :  { %212 = vmatpush.msrb.mxu0 %v192_v5 }
  0x30   :  { %142 = vmatpush.msra.mxu2 %v110_v39  ;;  %177 = vmatpush.msra.mxu3 %v151_v52 }
  0x31   :  { %213 = vmatpush.msrb.mxu0 %v191_v6 }
  0x32   :  { %178 = vmatpush.msra.mxu3 %v150_v57 }
  0x33   :  { %214 = vmatpush.msrb.mxu0 %v190_v7 }
  0x34   :  { %179 = vmatpush.msra.mxu3 %v149_v58 }
  0x35   :  { %215 = vmatpush.msrb.mxu0 %v189_v8 }
  0x36   :  { %180 = vmatpush.msra.mxu3 %v148_v59 }
  0x37   :  { %216 = vmatpush.msrb.mxu0 %v188_v13 }
  0x39   :  { %217 = vmatpush.msrb.mxu0 %v187_v14 }
  0x3b   :  { %218 = vmatpush.msrb.mxu0 %v186_v15 }
  0x8c   :  { %v68_v34 = vpop.f32.mrf.mxu0 }
  0x8d   :  { %v69_v35 = vadd.f32 %v68_v34, %v46_v33 }
  0x8f   :  { %v71_v36 = vmax.f32 %v69_v35, 0.0 }
  0x91   :  { %105 = vmatmul.f32.vlgmr.msra.gmra.mxu1 %v71_v36 }
 0x10e   :  { %v106_v54 = vpop.f32.mrf.mxu1 }
 0x10f   :  { %v107_v55 = vadd.f32 %v106_v54, %v88_v53 }
 0x111   :  { %v109_v56 = vmax.f32 %v107_v55, 0.0 }
 0x113   :  { %143 = vmatmul.f32.vlgmr.msra.gmra.mxu2 %v109_v56 }
 0x196   :  { %v144_v10 = vpop.f32.mrf.mxu2 }
 0x197   :  { %v145_v11 = vadd.f32 %v144_v10, %v126_v9 }
 0x199   :  { %v147_v12 = vmax.f32 %v145_v11, 0.0 }
 0x19b   :  { %181 = vmatmul.f32.vlgmr.msra.gmra.mxu3 %v147_v12 }
 0x21e   :  { %v182_v17 = vpop.f32.mrf.mxu3 }
 0x21f   :  { %v183_v18 = vadd.f32 %v182_v17, %v164_v16 }
 0x221   :  { %v185_v19 = vmax.f32 %v183_v18, 0.0 }
 0x223   :  { %219 = vmatmul.f32.vlgmr.msrb.gmra.mxu0 %v185_v19 }
 0x2a0   :  { %v220_v21 = vpop.f32.mrf.mxu0 }
 0x2a1   :  { %v221_v22 = vadd.f32 %v220_v21, %v202_v20 }
 0x2a3   :  { %223 = vst [vmem:[#allocation7] sm:$0xff] %v221_v22 }
 0x2a4   :  { %234 = dma.vmem_to_hbm [thread:$0]  %s230_s1, 128, %s232_s23, [#allocation4]  }
 0x2a5   :  { %324 = dma.done.wait [#allocation4], 128  }
 0x2a6   :  { %325 = vsyncadd [#allocation4], 4294967168 }
 0x2a7   :  { %239 = vsyncpa [#allocation3], 1 }
 0x2a8   :  { %240 = vsyncpa [#allocation6], 1 }
 0x2a9   :  { %241 = vsyncpa [#allocation4], 1 }

</bundles_post_ra>
